<compile_context>
chip_gen: v5e
topology: v5e:2x2
jax: 0.10.0
libtpu: 0.0.40
codegen_flags: <defaults>
</compile_context>

<pallas_src>
import jax
import jax.numpy as jnp
from jax.experimental import pallas as pl
from jax.experimental.pallas import tpu as pltpu


def _l2_normalize_kernel(x_ref, o_ref):
    # Upcast on the fly for the reduction; the f32 view is NOT kept live into
    # the final multiply (re-read + re-cast below) so Mosaic doesn't need a
    # full (tb, D) f32 buffer across the reduction.
    xf = x_ref[...].astype(jnp.float32)
    sq_sum = jnp.sum(xf * xf, axis=-1, keepdims=True)   # lane (XLU) reduction
    inv = jax.lax.rsqrt(sq_sum)                          # EUP rsqrt
    o_ref[...] = (x_ref[...].astype(jnp.float32) * inv).astype(o_ref.dtype)


def _tpu_config():
    """Returns (num_tensorcores, working_set_budget_bytes, vmem_limit_bytes)."""
    kind = ""
    try:
        kind = jax.devices()[0].device_kind.lower()
    except Exception:
        pass
    mib = 1024 * 1024
    if "7" in kind:
        # v7x: 2 TCs/chip, only 64 MiB VMEM per TC -> stay under the 32 MiB
        # scoped default; per-block target lands around 2-8 MiB.
        return 2, 24 * mib, 32 * mib
    if "6" in kind or "5" in kind:
        # v6e / v5e: 1 TC, 128 MiB physical VMEM -> raise scoped limit
        # explicitly and use a bigger working-set budget for larger tiles.
        return 1, 48 * mib, 64 * mib
    # Unknown generation: conservative defaults, leave the scoped limit alone.
    return 1, 12 * mib, None


def _choose_tb(B, D, dtype, *, budget_bytes, num_tc):
    """Largest dtype-aligned row tile whose pipelined working set
    (in + out double-buffered + one f32 temp block) fits the budget."""
    itemsize = jnp.dtype(dtype).itemsize
    sub = 8 * max(1, 4 // itemsize)              # 8 f32 / 16 bf16 / 32 int8
    padded_b = ((B + sub - 1) // sub) * sub

    # Per-row footprint: 2 x (in + out) double-buffered blocks + one f32 temp.
    bytes_per_row = 4 * D * itemsize + 4 * D
    max_rows = max(sub, int(budget_bytes // max(1, bytes_per_row)))
    tb = max(sub, min((max_rows // sub) * sub, padded_b))

    total_bytes = B * D * itemsize
    if total_bytes <= 512 * 1024:
        # Tiny problem: single step; per-step overhead dominates everything,
        # and TC sharding can't pay off at this size.
        return tb

    if num_tc >= 2:
        # v7x megacore: make sure both TensorCores get (balanced) work.
        steps = pl.cdiv(padded_b, tb)
        if steps < 2 and padded_b >= 2 * sub:
            half = ((pl.cdiv(padded_b, 2) + sub - 1) // sub) * sub
            tb = max(sub, min(tb, half))
        else:
            if steps > 1 and steps % 2 == 1:
                cand = ((pl.cdiv(padded_b, steps + 1) + sub - 1) // sub) * sub
                cand = max(sub, min(cand, tb))
                if pl.cdiv(padded_b, cand) % 2 == 0:
                    tb = cand
    return tb


def normalize(x, *, p=2, tb=None):
    # TODO(synk): only p=2 is implemented in-kernel (module default); other p
    # values would need a different reduction expression.
    assert p == 2, "only p=2 supported"
    B, D = x.shape
    num_tc, budget_bytes, vmem_limit = _tpu_config()
    if tb is None:
        tb = _choose_tb(B, D, x.dtype, budget_bytes=budget_bytes, num_tc=num_tc)
    grid = (pl.cdiv(B, tb),)

    cp_kwargs = dict(dimension_semantics=("parallel",))
    if vmem_limit is not None:
        cp_kwargs["vmem_limit_bytes"] = int(vmem_limit)

    return pl.pallas_call(
        _l2_normalize_kernel,
        out_shape=jax.ShapeDtypeStruct((B, D), x.dtype),
        grid_spec=pl.GridSpec(
            grid=grid,
            # Full feature dim D stays in one block — the L2 reduction needs
            # whole-row visibility; only tb scales with the VMEM budget.
            in_specs=[pl.BlockSpec((tb, D), lambda i: (i, 0))],
            out_specs=pl.BlockSpec((tb, D), lambda i: (i, 0)),
        ),
        compiler_params=pltpu.CompilerParams(**cp_kwargs),
    )(x)


if __name__ == "__main__":
    key = jax.random.PRNGKey(0)
    # batch=24, hidden=256 — small feature-embedding shape, matching the
    # [B, D] usage of the module (dim=1 normalization).
    x = jax.random.normal(key, (24, 256), dtype=jnp.float32)

    out = normalize(x, p=2)
    out = jax.block_until_ready(out)

    # reference check (plain JAX), same semantics as the torch module
    ref = x / jnp.linalg.norm(x, ord=2, axis=1, keepdims=True)
    assert out.shape == x.shape and out.dtype == x.dtype
    assert jnp.allclose(out, ref, atol=1e-5, rtol=1e-5)

    print("KERNEL_OK")
</pallas_src>

<mosaic_0001>
module attributes {stable_mosaic.version = 11 : i64} {
  func.func @_l2_normalize_kernel(%arg0: i32, %arg1: memref<24x256xf32, #tpu.memory_space<vmem>>, %arg2: memref<24x256xf32, #tpu.memory_space<vmem>>) attributes {dimension_semantics = [#tpu.dimension_semantics<parallel>], iteration_bounds = array<i64: 1>, scalar_prefetch = 0 : i64, scratch_operands = 0 : i64, tpu.core_type = #tpu.core_type<tc>, window_params = [{transform_indices = @transform_0, window_bounds = array<i64: 24, 256>}, {transform_indices = @transform_1, window_bounds = array<i64: 24, 256>}]} {
    %c0 = arith.constant 0 : index
    %c0_0 = arith.constant 0 : index
    %0 = vector.load %arg1[%c0, %c0_0] : memref<24x256xf32, #tpu.memory_space<vmem>>, vector<24x256xf32>
    %1 = arith.mulf %0, %0 : vector<24x256xf32>
    %cst = arith.constant dense<0.000000e+00> : vector<24xf32>
    %2 = vector.multi_reduction <add>, %1, %cst [1] : vector<24x256xf32> to vector<24xf32>
    %3 = vector.shape_cast %2 : vector<24xf32> to vector<24x1xf32>
    %4 = math.rsqrt %3 : vector<24x1xf32>
    %c0_1 = arith.constant 0 : index
    %c0_2 = arith.constant 0 : index
    %5 = vector.load %arg1[%c0_1, %c0_2] : memref<24x256xf32, #tpu.memory_space<vmem>>, vector<24x256xf32>
    %6 = vector.broadcast %4 : vector<24x1xf32> to vector<24x256xf32>
    %7 = arith.mulf %5, %6 : vector<24x256xf32>
    %c0_3 = arith.constant 0 : index
    %c0_4 = arith.constant 0 : index
    %8 = vector.load %arg2[%c0_3, %c0_4] : memref<24x256xf32, #tpu.memory_space<vmem>>, vector<24x256xf32>
    tpu.vector_store %arg2[%c0_3, %c0_4], %7 {strides = array<i32>} : memref<24x256xf32, #tpu.memory_space<vmem>>, vector<24x256xf32>,
    return
  }
  func.func @transform_0(%arg0: i32) -> (i32, i32) {
    %c0_i32 = arith.constant 0 : i32
    %c0_i32_0 = arith.constant 0 : i32
    return %arg0, %c0_i32 : i32, i32
  }
  func.func @transform_1(%arg0: i32) -> (i32, i32) {
    %c0_i32 = arith.constant 0 : i32
    %c0_i32_0 = arith.constant 0 : i32
    return %arg0, %c0_i32 : i32, i32
  }
}

</mosaic_0001>

<bundles_post_ra>
// kernel: tpu_custom_call.1
= control target key start
LH: loop header
LB: loop body
LE: loop exit
PB: predicated region body
PF: predicated region fallthrough
CT: control target
= control target key end

     0   :  { %6 = vsyncpa [#allocation3], 0  ;;  %s195_s0 = inlined_call_operand.hbm [shape: f32[24,256], index: 0, kind: input, shape index: {}]   ;;  %s196_s1 = inlined_call_operand.hbm [shape: f32[24,256], index: 1, kind: output, shape index: {}]  }
   0x1   :  { %7 = vsyncpa [#allocation4], 0  ;;  %s12_s8 = sshll.u32 %s195_s0, 4  ;;  %s169_s9 = smov [#allocation2]   ;;  %s13_s8 = int_to_ptr.hbm [resolvable:$true] %s12_s8 }
   0x2   :  { %s14_s10 = sshll.u32 %s169_s9, 4  ;;  %s170_s11 = smov 256   ;;  %s15_s10 = int_to_ptr.vmem [resolvable:$true] %s14_s10 }
   0x3   :  { %s171_s12 = smov 16  }
   0x4   :  { %20 = dma.hbm_to_vmem [thread:$0]  %s13_s8, 768, %s15_s10, [#allocation3], %s170_s11, %s170_s11, %s171_s12  }
   0x5   :  { %165 = dma.done.wait [#allocation3], 768  }
   0x6   :  { %166 = vsyncadd [#allocation3], 4294966528  ;;  %v29_v0 = vld [vmem:[#allocation2 + $0x20] sm:$0xff]  ;;  %v30_v1 = vld [vmem:[#allocation2 + $0x28] sm:$0xff]  ;;  %s172_s0 = smov [#allocation5]   ;;  %s94_s16 = sshll.u32 %s196_s1, 4  ;;  %s95_s16 = int_to_ptr.hbm [resolvable:$true] %s94_s16 }
   0x7   :  { %v25_v2 = vld [vmem:[#allocation2] sm:$0xff]  ;;  %v35_v3 = vmul.f32 %v29_v0, %v29_v0  ;;  %v36_v4 = vmul.f32 %v30_v1, %v30_v1  ;;  %v26_v5 = vld [vmem:[#allocation2 + $0x8] sm:$0xff]  ;;  %v27_v9 = vld [vmem:[#allocation2 + $0x10] sm:$0xff]  ;;  %s92_s13 = sshll.u32 %s172_s0, 4  ;;  %s93_s13 = int_to_ptr.vmem [resolvable:$true] %s92_s13 }
   0x8   :  { %v31_v6 = vmul.f32 %v25_v2, %v25_v2  ;;  %v32_v7 = vmul.f32 %v26_v5, %v26_v5  ;;  %v28_v10 = vld [vmem:[#allocation2 + $0x18] sm:$0xff]  ;;  %v33_v12 = vmul.f32 %v27_v9, %v27_v9 }
   0x9   :  { %v43_v8 = vadd.f32 %v36_v4, %v35_v3  ;;  %v34_v13 = vmul.f32 %v28_v10, %v28_v10 }
   0xa   :  { %v37_v11 = vadd.f32 %v32_v7, %v31_v6 }
   0xb   :  { %44 = vadd.xlane.f32.xlu1 %v43_v8  ;;  %v40_v14 = vadd.f32 %v34_v13, %v33_v12 }
   0xc   :  { %38 = vadd.xlane.f32.xlu0 %v37_v11 }
  0x14   :  { %41 = vadd.xlane.f32.xlu0 %v40_v14 }
  0x7e   :  { %v45_v15 = vpop.xlane.xlu1 %44 }
  0x7f   :  { %111 = vrsqrt.f32 %v45_v15  ;;  %v39_v16 = vpop.xlane.xlu0 %38  ;;  %vm72_vm0 = vweird.f32 %v45_v15 }
  0x80   :  { %113 = vrsqrt.f32 %v39_v16  ;;  %vm52_vm4 = vweird.f32 %v39_v16 }
  0x85   :  { %v112_v17 = vpop.eup %111 }
  0x86   :  { %v114_v18 = vpop.eup %113  ;;  %v67_v19 = vmul.f32 %v112_v17, %v45_v15  ;;  %vm73_vm1 = vweird.f32 %v112_v17 }
  0x87   :  { %v47_v20 = vmul.f32 %v114_v18, %v39_v16  ;;  %v42_v21 = vpop.xlane.xlu0 %41  ;;  %vm53_vm2 = vweird.f32 %v114_v18  ;;  %vm74_vm3 = vmor %vm72_vm0, %vm73_vm1 }
  0x88   :  { %v68_v22 = vmul.f32 %v112_v17, %v67_v19  ;;  %115 = vrsqrt.f32 %v42_v21  ;;  %vm54_vm5 = vmor %vm52_vm4, %vm53_vm2  ;;  %vm62_vm7 = vweird.f32 %v42_v21 }
  0x89   :  { %v48_v23 = vmul.f32 %v114_v18, %v47_v20 }
  0x8a   :  { %v69_v24 = vmul.f32 0.5, %v68_v22 }
  0x8b   :  { %v49_v25 = vmul.f32 0.5, %v48_v23 }
  0x8c   :  { %v70_v26 = vsub.f32 1.5, %v69_v24 }
  0x8d   :  { %v50_v27 = vsub.f32 1.5, %v49_v25 }
  0x8e   :  { %v116_v28 = vpop.eup %115  ;;  %v71_v29 = vmul.f32 %v112_v17, %v70_v26 }
  0x8f   :  { %v51_v30 = vmul.f32 %v114_v18, %v50_v27  ;;  %v57_v31 = vmul.f32 %v116_v28, %v42_v21  ;;  %vm63_vm6 = vweird.f32 %v116_v28 }
  0x90   :  { %v75_v32 = vsel %vm74_vm3, %v112_v17, %v71_v29  ;;  %vm64_vm8 = vmor %vm62_vm7, %vm63_vm6 }
  0x91   :  { %v80_v33 = vmul.f32 %v75_v32, %v29_v0  ;;  %v81_v34 = vmul.f32 %v75_v32, %v30_v1  ;;  %v55_v35 = vsel %vm54_vm5, %v114_v18, %v51_v30  ;;  %v58_v36 = vmul.f32 %v116_v28, %v57_v31 }
  0x92   :  { %v76_v37 = vmul.f32 %v55_v35, %v25_v2  ;;  %v77_v38 = vmul.f32 %v55_v35, %v26_v5 }
  0x93   :  { %86 = vst [vmem:[#allocation5 + $0x20] sm:$0xff] %v80_v33  ;;  %v59_v39 = vmul.f32 0.5, %v58_v36 }
  0x94   :  { %87 = vst [vmem:[#allocation5 + $0x28] sm:$0xff] %v81_v34 }
  0x95   :  { %82 = vst [vmem:[#allocation5] sm:$0xff] %v76_v37  ;;  %v60_v40 = vsub.f32 1.5, %v59_v39 }
  0x96   :  { %83 = vst [vmem:[#allocation5 + $0x8] sm:$0xff] %v77_v38 }
  0x97   :  { %v61_v41 = vmul.f32 %v116_v28, %v60_v40 }
  0x99   :  { %v65_v42 = vsel %vm64_vm8, %v116_v28, %v61_v41 }
  0x9a   :  { %v78_v43 = vmul.f32 %v65_v42, %v27_v9  ;;  %v79_v44 = vmul.f32 %v65_v42, %v28_v10 }
  0x9c   :  { %84 = vst [vmem:[#allocation5 + $0x10] sm:$0xff] %v78_v43 }
  0x9d   :  { %85 = vst [vmem:[#allocation5 + $0x18] sm:$0xff] %v79_v44 }
  0x9e   :  { %100 = dma.vmem_to_hbm [thread:$0]  %s93_s13, 768, %s95_s16, [#allocation4], %s170_s11, %s170_s11, %s171_s12  }
  0x9f   :  { %167 = dma.done.wait [#allocation4], 768  }
  0xa0   :  { %168 = vsyncadd [#allocation4], 4294966528 }
  0xa1   :  { %105 = vsyncpa [#allocation3], 1 }
  0xa2   :  { %106 = vsyncpa [#allocation4], 1 }

</bundles_post_ra>
